<compile_context>
chip_gen: v6e
topology: v6e:2x2x1
jax: 0.10.0
libtpu: 0.0.40
codegen_flags: <defaults>
</compile_context>

<pallas_src>
import jax
import jax.numpy as jnp
from jax.experimental import pallas as pl
from jax.experimental.pallas import tpu as pltpu

EPS = 1e-5
FEATURES = 100


def bn_linear_relu_kernel(x_ref, gamma_ref, beta_ref, wt_ref, b_ref, o_ref):
    # x_ref:     (N, F)  f32
    # gamma_ref: (1, F)  f32  BatchNorm1d weight
    # beta_ref:  (1, F)  f32  BatchNorm1d bias
    # wt_ref:    (F, F)  f32  Linear weight transposed -> (in, out)
    # b_ref:     (1, F)  f32  Linear bias
    x = x_ref[...]
    inv_n = jnp.float32(1.0 / x.shape[0])

    # BatchNorm1d, training-mode semantics: batch mean, biased batch variance.
    # Two-pass centered variance: numerically safe (never negative before eps).
    mean = jnp.sum(x, axis=0, keepdims=True) * inv_n
    xc = x - mean
    var = jnp.sum(xc * xc, axis=0, keepdims=True) * inv_n
    xn = xc * jax.lax.rsqrt(var + EPS)
    xn = xn * gamma_ref[...] + beta_ref[...]

    # Linear: y = xn @ W^T + b, f32 operands, f32 accumulation on the MXU.
    y = jnp.dot(
        xn,
        wt_ref[...],
        preferred_element_type=jnp.float32,
        precision=jax.lax.Precision.HIGHEST,
    ) + b_ref[...]

    # ReLU
    o_ref[...] = jnp.maximum(y, 0.0)


def prepare_params(gamma, beta, weight, bias):
    """One-time parameter prep: transpose W to (in, out), reshape rows."""
    f = weight.shape[0]
    return (
        gamma.astype(jnp.float32).reshape(1, f),
        beta.astype(jnp.float32).reshape(1, f),
        weight.T.astype(jnp.float32),            # (in, out)
        bias.astype(jnp.float32).reshape(1, f),
    )


@jax.jit
def model_forward(x, gamma_p, beta_p, wt_p, bias_p):
    n, f = x.shape

    vmem = pl.BlockSpec(memory_space=pltpu.MemorySpace.VMEM)
    cost = pl.CostEstimate(
        flops=2 * n * f * f + 6 * n * f,        # matmul + BN elementwise
        transcendentals=f,                      # rsqrt per feature
        bytes_accessed=(n * f * 4               # x
                        + f * f * 4             # W^T
                        + 3 * f * 4             # gamma, beta, bias
                        + n * f * 4),           # out
    )

    return pl.pallas_call(
        bn_linear_relu_kernel,
        out_shape=jax.ShapeDtypeStruct((n, f), jnp.float32),
        in_specs=[vmem] * 5,
        out_specs=vmem,
        cost_estimate=cost,
    )(x, gamma_p, beta_p, wt_p, bias_p)


def reference_forward(x, gamma, beta, weight, bias):
    """Pure-JAX reference matching PyTorch BN1d(train) -> Linear -> ReLU."""
    mean = jnp.mean(x, axis=0, keepdims=True)
    var = jnp.mean((x - mean) ** 2, axis=0, keepdims=True)  # biased
    xn = (x - mean) / jnp.sqrt(var + EPS) * gamma + beta
    y = xn @ weight.T + bias
    return jnp.maximum(y, 0.0)


if __name__ == "__main__":
    key = jax.random.PRNGKey(0)
    k_x, k_w, k_b = jax.random.split(key, 3)

    N = 8  # batch size (BatchNorm1d training-mode needs N >= 2)
    x = jax.random.normal(k_x, (N, FEATURES), dtype=jnp.float32)

    # BatchNorm1d(100) parameters: default init weight=1, bias=0
    gamma = jnp.ones((FEATURES,), dtype=jnp.float32)
    beta = jnp.zeros((FEATURES,), dtype=jnp.float32)

    # Linear(100, 100) parameters: PyTorch-style uniform(-1/sqrt(fan_in), ...)
    bound = 1.0 / jnp.sqrt(jnp.float32(FEATURES))
    weight = jax.random.uniform(
        k_w, (FEATURES, FEATURES), minval=-bound, maxval=bound, dtype=jnp.float32
    )
    bias = jax.random.uniform(
        k_b, (FEATURES,), minval=-bound, maxval=bound, dtype=jnp.float32
    )

    # One-time parameter preparation (hoisted out of the per-call path).
    gamma_p, beta_p, wt_p, bias_p = jax.block_until_ready(
        prepare_params(gamma, beta, weight, bias)
    )

    out = model_forward(x, gamma_p, beta_p, wt_p, bias_p)
    out = jax.block_until_ready(out)

    ref = reference_forward(x, gamma, beta, weight, bias)

    assert out.shape == (N, FEATURES)
    assert bool(jnp.all(out >= 0.0))                        # ReLU sanity
    assert bool(jnp.all(jnp.isfinite(out)))                 # no NaN/Inf
    assert bool(jnp.allclose(out, ref, atol=1e-4, rtol=1e-4))
    print("KERNEL_OK")
</pallas_src>

<mosaic_0001>
module attributes {stable_mosaic.version = 11 : i64} {
  func.func @bn_linear_relu_kernel(%arg0: memref<8x100xf32, #tpu.memory_space<vmem>>, %arg1: memref<1x100xf32, #tpu.memory_space<vmem>>, %arg2: memref<1x100xf32, #tpu.memory_space<vmem>>, %arg3: memref<100x100xf32, #tpu.memory_space<vmem>>, %arg4: memref<1x100xf32, #tpu.memory_space<vmem>>, %arg5: memref<8x100xf32, #tpu.memory_space<vmem>>) attributes {dimension_semantics = [], scalar_prefetch = 0 : i64, scratch_operands = 0 : i64, tpu.core_type = #tpu.core_type<tc>} {
    %c0 = arith.constant 0 : index
    %c0_0 = arith.constant 0 : index
    %0 = vector.load %arg0[%c0, %c0_0] : memref<8x100xf32, #tpu.memory_space<vmem>>, vector<8x100xf32>
    %cst = arith.constant dense<0.000000e+00> : vector<100xf32>
    %1 = vector.multi_reduction <add>, %0, %cst [0] : vector<8x100xf32> to vector<100xf32>
    %2 = vector.shape_cast %1 : vector<100xf32> to vector<1x100xf32>
    %cst_1 = arith.constant 1.250000e-01 : f32
    %3 = vector.broadcast %cst_1 : f32 to vector<1x100xf32>
    %4 = arith.mulf %2, %3 : vector<1x100xf32>
    %5 = vector.broadcast %4 : vector<1x100xf32> to vector<8x100xf32>
    %6 = arith.subf %0, %5 : vector<8x100xf32>
    %7 = arith.mulf %6, %6 : vector<8x100xf32>
    %cst_2 = arith.constant dense<0.000000e+00> : vector<100xf32>
    %8 = vector.multi_reduction <add>, %7, %cst_2 [0] : vector<8x100xf32> to vector<100xf32>
    %9 = vector.shape_cast %8 : vector<100xf32> to vector<1x100xf32>
    %cst_3 = arith.constant 1.250000e-01 : f32
    %10 = vector.broadcast %cst_3 : f32 to vector<1x100xf32>
    %11 = arith.mulf %9, %10 : vector<1x100xf32>
    %cst_4 = arith.constant 9.99999974E-6 : f32
    %12 = vector.broadcast %cst_4 : f32 to vector<1x100xf32>
    %13 = arith.addf %11, %12 : vector<1x100xf32>
    %14 = math.rsqrt %13 : vector<1x100xf32>
    %15 = vector.broadcast %14 : vector<1x100xf32> to vector<8x100xf32>
    %16 = arith.mulf %6, %15 : vector<8x100xf32>
    %c0_5 = arith.constant 0 : index
    %c0_6 = arith.constant 0 : index
    %17 = vector.load %arg1[%c0_5, %c0_6] : memref<1x100xf32, #tpu.memory_space<vmem>>, vector<1x100xf32>
    %18 = vector.broadcast %17 : vector<1x100xf32> to vector<8x100xf32>
    %19 = arith.mulf %16, %18 : vector<8x100xf32>
    %c0_7 = arith.constant 0 : index
    %c0_8 = arith.constant 0 : index
    %20 = vector.load %arg2[%c0_7, %c0_8] : memref<1x100xf32, #tpu.memory_space<vmem>>, vector<1x100xf32>
    %21 = vector.broadcast %20 : vector<1x100xf32> to vector<8x100xf32>
    %22 = arith.addf %19, %21 : vector<8x100xf32>
    %c0_9 = arith.constant 0 : index
    %c0_10 = arith.constant 0 : index
    %23 = vector.load %arg3[%c0_9, %c0_10] : memref<100x100xf32, #tpu.memory_space<vmem>>, vector<100x100xf32>
    %cst_11 = arith.constant dense<0.000000e+00> : vector<8x100xf32>
    %24 = tpu.matmul %22, %23, %cst_11 {dimension_numbers = #tpu.dot_dimension_numbers<[1], [0], [0], [1], [0, 0, 1, 1], [], []>, precision = #tpu.contract_precision<fp32>} : vector<8x100xf32>, vector<100x100xf32>, vector<8x100xf32> -> vector<8x100xf32>
    %c0_12 = arith.constant 0 : index
    %c0_13 = arith.constant 0 : index
    %25 = vector.load %arg4[%c0_12, %c0_13] : memref<1x100xf32, #tpu.memory_space<vmem>>, vector<1x100xf32>
    %26 = vector.broadcast %25 : vector<1x100xf32> to vector<8x100xf32>
    %27 = arith.addf %24, %26 : vector<8x100xf32>
    %cst_14 = arith.constant 0.000000e+00 : f32
    %28 = vector.broadcast %cst_14 : f32 to vector<8x100xf32>
    %29 = arith.maximumf %27, %28 : vector<8x100xf32>
    %c0_15 = arith.constant 0 : index
    %c0_16 = arith.constant 0 : index
    %30 = vector.load %arg5[%c0_15, %c0_16] : memref<8x100xf32, #tpu.memory_space<vmem>>, vector<8x100xf32>
    tpu.vector_store %arg5[%c0_15, %c0_16], %29 {strides = array<i32>} : memref<8x100xf32, #tpu.memory_space<vmem>>, vector<8x100xf32>,
    return
  }
}

</mosaic_0001>

<bundles_post_ra>
// kernel: model_forward.1
= control target key start
LH: loop header
LB: loop body
LE: loop exit
PB: predicated region body
PF: predicated region fallthrough
CT: control target
= control target key end

     0   :  { %10 = vsyncpa [#allocation3], 0  ;;  %s1428_s0 = inlined_call_operand.hbm [shape: f32[8,100], index: 0, kind: input, shape index: {}]   ;;  %s1429_s1 = inlined_call_operand.vmem [shape: f32[1,100], index: 1, kind: input, shape index: {}]   ;;  %s1430_s2 = inlined_call_operand.vmem [shape: f32[1,100], index: 2, kind: input, shape index: {}]   ;;  %s1431_s3 = inlined_call_operand.hbm [shape: f32[100,100], index: 3, kind: input, shape index: {}]   ;;  %s1432_s4 = inlined_call_operand.vmem [shape: f32[1,100], index: 4, kind: input, shape index: {}]   ;;  %s1433_s5 = inlined_call_operand.hbm [shape: f32[8,100], index: 5, kind: output, shape index: {}]  }
   0x1   :  { %11 = vsyncpa [#allocation6], 0 }
   0x2   :  { %12 = vsyncpa [#allocation4], 0  ;;  %s1069_s18 = smov [#allocation2]   ;;  %s1070_s20 = smov [#allocation5]  }
   0x3   :  { %s19_s19 = sshll.u32 %s1069_s18, 4  ;;  %s32_s21 = sshll.u32 %s1070_s20, 4  ;;  %s20_s19 = int_to_ptr.vmem [resolvable:$true] %s19_s19  ;;  %s33_s21 = int_to_ptr.vmem [resolvable:$true] %s32_s21 }
   0x4   :  { %s1011_s22 = scalar_lea.vmem %s20_s19, 128  ;;  %p1016_p1 = scmp.lt.s32.totalorder %s20_s19, %s20_s19 }
   0x5   :  { %p1012_p0 = scmp.ne.s32.totalorder %s20_s19, %s1011_s22  ;;  %p1017_p2 = scmp.lt.s32.totalorder %s1011_s22, %s1011_s22 }
   0x7   :  { %p1018_p3 = por %p1017_p2, %p1016_p1 }
   0x9   :  { %p1019_p4 = pnand %p1018_p3, %p1012_p0 }
   0xb   :  { %1022 = shalt.err (!%p1019_p4)
}
   0xc   :  { %22 = dma.hbm_to_vmem [thread:$0]  %s1428_s0, 128, %s20_s19, [#allocation3]  }
   0xd   :  { %s1031_s25 = scalar_lea.vmem %s33_s21, 1664  ;;  %p1036_p6 = scmp.lt.s32.totalorder %s33_s21, %s33_s21 }
   0xe   :  { %p1032_p5 = scmp.ne.s32.totalorder %s33_s21, %s1031_s25  ;;  %p1037_p7 = scmp.lt.s32.totalorder %s1031_s25, %s1031_s25 }
  0x10   :  { %p1038_p8 = por %p1037_p7, %p1036_p6 }
  0x12   :  { %p1039_p9 = pnand %p1038_p8, %p1032_p5 }
  0x14   :  { %1042 = shalt.err (!%p1039_p9)
}
  0x15   :  { %s1071_s26 = smov 128   ;;  %s1072_s27 = smov 8  }
  0x16   :  { %38 = dma.hbm_to_vmem [thread:$0]  %s1431_s3, 1664, %s33_s21, [#allocation6], %s1071_s26, %s1071_s26, %s1072_s27  }
  0x17   :  { %1063 = dma.done.wait [#allocation3], 128  }
  0x18   :  { %1064 = vsyncadd [#allocation3], 4294967168 }
  0x19   :  { %1065 = dma.done.wait [#allocation6], 1664  }
  0x1a   :  { %1066 = vsyncadd [#allocation6], 4294965632  ;;  %v1073_v0 = vmov 0.0   ;;  %vm1074_vm0 = vmmov 0   ;;  %vm109_vm1 = vcmask 1043456   ;;  %v97_v2 = vld [vmem:[#allocation5 + $0x58] sm:$0xff] }
  0x1b   :  { %820 = vmatprep.subr.mxu0 %v1073_v0  ;;  %849 = vmatprep.subr.mxu1 %v1073_v0  ;;  %v98_v1 = vld [vmem:[#allocation5 + $0x60] sm:$0xf]  ;;  %v96_v3 = vld [vmem:[#allocation5 + $0x50] sm:$0xff]  ;;  %v1118_v5 = vand.u32 4294901760, %v97_v2  ;;  %v95_v7 = vld [vmem:[#allocation5 + $0x48] sm:$0xff]  ;;  %vm48_vm2 = vcmask 818176  }
  0x1c   :  { %846 = vmatprep.mubr.msk.f32.mxu0 %vm1074_vm0, %v1073_v0  ;;  %875 = vmatprep.mubr.msk.f32.mxu1 %vm1074_vm0, %v1073_v0  ;;  %v111_v4 = vsel %vm109_vm1, %v98_v1, 0  ;;  %v1120_v6 = vand.u32 4294901760, %v96_v3  ;;  %v94_v8 = vld [vmem:[#allocation5 + $0x40] sm:$0xff]  ;;  %v93_v9 = vld [vmem:[#allocation5 + $0x38] sm:$0xff]  ;;  %v1124_v11 = vand.u32 4294901760, %v95_v7  ;;  %v92_v14 = vld [vmem:[#allocation5 + $0x30] sm:$0xff] }
  0x1d   :  { %v1122_v10 = vand.u32 4294901760, %v111_v4  ;;  %v1126_v12 = vand.u32 4294901760, %v94_v8  ;;  %v1128_v13 = vand.u32 4294901760, %v93_v9  ;;  %v91_v15 = vld [vmem:[#allocation5 + $0x28] sm:$0xff]  ;;  %v1131_v16 = vsub.f32 %v97_v2, %v1118_v5  ;;  %v90_v33 = vld [vmem:[#allocation5 + $0x20] sm:$0xff]  ;;  %v89_v34 = vld [vmem:[#allocation5 + $0x18] sm:$0xff] }
  0x1e   :  { %v1134_v17 = vsub.f32 %v96_v3, %v1120_v6  ;;  %v1136_v18 = vand.u32 4294901760, %v92_v14  ;;  %v1143_v20 = vsub.f32 %v95_v7, %v1124_v11  ;;  %v1151_v24 = vand.u32 4294901760, %v91_v15  ;;  %v88_v36 = vld [vmem:[#allocation5 + $0x10] sm:$0xff]  ;;  %v1178_v37 = vld [vmem:[#allocation2] sm:$0xff]  ;;  %v87_v45 = vld [vmem:[#allocation5 + $0x8] sm:$0xff]  ;;  %s1075_s7 = smov [#allocation7]  }
  0x1f   :  { %821 = vmatpush3.msra.mxu0 %v1122_v10  ;;  %v1140_v19 = vsub.f32 %v111_v4, %v1122_v10  ;;  %v1146_v21 = vsub.f32 %v94_v8, %v1126_v12  ;;  %v217_v22 = vand.u32 4294901760, %v1131_v16  ;;  %v1157_v27 = vsub.f32 %v93_v9, %v1128_v13  ;;  %v86_v52 = vld [vmem:[#allocation5] sm:$0xff]  ;;  %s723_s8 = sshll.u32 %s1075_s7, 4  ;;  %s724_s8 = int_to_ptr.vmem [resolvable:$true] %s723_s8 }
  0x20   :  { %822 = vmatprep.subr.mxu0 %v1073_v0  ;;  %v224_v23 = vand.u32 4294901760, %v1134_v17  ;;  %v231_v26 = vand.u32 4294901760, %v1143_v20  ;;  %v1164_v29 = vsub.f32 %v92_v14, %v1136_v18  ;;  %v1176_v35 = vsub.f32 %v91_v15, %v1151_v24  ;;  %s1043_s9 = scalar_lea.vmem %s724_s8, 128  ;;  %p1048_p11 = scmp.lt.s32.totalorder %s724_s8, %s724_s8 }
  0x21   :  { %v210_v25 = vand.u32 4294901760, %v1140_v19  ;;  %823 = vmatpush3.msra.mxu0 %v1118_v5  ;;  %v218_v28 = vsub.f32 %v1131_v16, %v217_v22  ;;  %v238_v32 = vand.u32 4294901760, %v1146_v21  ;;  %v245_v41 = vand.u32 4294901760, %v1157_v27  ;;  %p1044_p10 = scmp.ne.s32.totalorder %s724_s8, %s1043_s9  ;;  %p1049_p12 = scmp.lt.s32.totalorder %s1043_s9, %s1043_s9 }
  0x22   :  { %824 = vmatprep.subr.mxu0 %v1073_v0  ;;  %v225_v31 = vsub.f32 %v1134_v17, %v224_v23  ;;  %v232_v40 = vsub.f32 %v1143_v20, %v231_v26  ;;  %v252_v42 = vand.u32 4294901760, %v1164_v29  ;;  %v1187_v43 = vand.u32 4294901760, %v90_v33 }
  0x23   :  { %v211_v30 = vsub.f32 %v1140_v19, %v210_v25  ;;  %825 = vmatpush3.msra.mxu0 %v1120_v6  ;;  %v219_v39 = vand.u32 4294901760, %v218_v28  ;;  %v1189_v44 = vand.u32 4294901760, %v89_v34  ;;  %v239_v47 = vsub.f32 %v1146_v21, %v238_v32  ;;  %p1050_p13 = por %p1049_p12, %p1048_p11 }
  0x24   :  { %826 = vmatprep.subr.mxu0 %v1073_v0  ;;  %v226_v46 = vand.u32 4294901760, %v225_v31  ;;  %v1195_v48 = vand.u32 4294901760, %v88_v36  ;;  %v49_v49 = vsel %vm48_vm2, %v1178_v37, 0.0  ;;  %v259_v50 = vand.u32 4294901760, %v1176_v35 }
  0x25   :  { %v212_v38 = vand.u32 4294901760, %v211_v30  ;;  %827 = vmatpush3.msra.mxu0 %v1124_v11  ;;  %v1203_v51 = vsub.f32 %v90_v33, %v1187_v43  ;;  %v50_v53 = vrot.slane %v49_v49, 4  ;;  %v233_v54 = vand.u32 4294901760, %v232_v40  ;;  %p1051_p0 = pnand %p1050_p13, %p1044_p10 }
  0x26   :  { %828 = vmatprep.subr.mxu0 %v1073_v0  ;;  %v246_v55 = vsub.f32 %v1157_v27, %v245_v41  ;;  %v1210_v56 = vsub.f32 %v89_v34, %v1189_v44  ;;  %v1212_v57 = vand.u32 4294901760, %v87_v45  ;;  %v253_v58 = vsub.f32 %v1164_v29, %v252_v42 }
  0x27   :  { %850 = vmatpush3.msra.mxu1 %v212_v38  ;;  %829 = vmatpush3.msra.mxu0 %v1126_v12  ;;  %v51_v59 = vadd.f32 %v50_v53, %v49_v49  ;;  %v240_v60 = vand.u32 4294901760, %v239_v47  ;;  %v266_v61 = vand.u32 4294901760, %v1203_v51  ;;  %v1222_v62 = vsub.f32 %v88_v36, %v1195_v48 }
  0x28   :  { %851 = vmatprep.subr.mxu1 %v1073_v0  ;;  %830 = vmatprep.subr.mxu0 %v1073_v0  ;;  %v1224_v63 = vand.u32 4294901760, %v86_v52  ;;  %v247_v2 = vand.u32 4294901760, %v246_v55  ;;  %v260_v3 = vsub.f32 %v1176_v35, %v259_v50  ;;  %v273_v4 = vand.u32 4294901760, %v1210_v56 }
  0x29   :  { %852 = vmatpush3.msra.mxu1 %v219_v39  ;;  %831 = vmatpush3.msra.mxu0 %v1128_v13  ;;  %v52_v1 = vrot.slane %v51_v59, 2  ;;  %v1234_v7 = vsub.f32 %v87_v45, %v1212_v57  ;;  %v254_v9 = vand.u32 4294901760, %v253_v58  ;;  %v267_v14 = vsub.f32 %v1203_v51, %v266_v61 }
  0x2a   :  { %853 = vmatprep.subr.mxu1 %v1073_v0  ;;  %832 = vmatprep.subr.mxu0 %v1073_v0  ;;  %v280_v15 = vand.u32 4294901760, %v1222_v62  ;;  %v1244_v28 = vsub.f32 %v86_v52, %v1224_v63  ;;  %v261_v31 = vand.u32 4294901760, %v260_v3  ;;  %v274_v33 = vsub.f32 %v1210_v56, %v273_v4 }
  0x2b   :  { %854 = vmatpush3.msra.mxu1 %v226_v46  ;;  %833 = vmatpush3.msra.mxu0 %v1136_v18  ;;  %v53_v8 = vadd.f32 %v52_v1, %v51_v59  ;;  %v287_v34 = vand.u32 4294901760, %v1234_v7  ;;  %v268_v38 = vand.u32 4294901760, %v267_v14 }
  0x2c   :  { %855 = vmatprep.subr.mxu1 %v1073_v0  ;;  %834 = vmatprep.subr.mxu0 %v1073_v0  ;;  %v281_v39 = vsub.f32 %v1222_v62, %v280_v15  ;;  %v294_v40 = vand.u32 4294901760, %v1244_v28  ;;  %v275_v46 = vand.u32 4294901760, %v274_v33 }
  0x2d   :  { %856 = vmatpush3.msra.mxu1 %v233_v54  ;;  %835 = vmatpush3.msra.mxu0 %v1151_v24  ;;  %v54_v30 = vrot.slane %v53_v8, 1  ;;  %v288_v47 = vsub.f32 %v1234_v7, %v287_v34 }
  0x2e   :  { %857 = vmatprep.subr.mxu1 %v1073_v0  ;;  %836 = vmatprep.subr.mxu0 %v1073_v0  ;;  %v282_v52 = vand.u32 4294901760, %v281_v39  ;;  %v295_v53 = vsub.f32 %v1244_v28, %v294_v40 }
  0x2f   :  { %858 = vmatpush3.msra.mxu1 %v240_v60  ;;  %837 = vmatpush3.msra.mxu0 %v1187_v43  ;;  %v55_v36 = vadd.f32 %v54_v30, %v53_v8  ;;  %v289_v55 = vand.u32 4294901760, %v288_v47 }
  0x30   :  { %859 = vmatprep.subr.mxu1 %v1073_v0  ;;  %838 = vmatprep.subr.mxu0 %v1073_v0 }
  0x31   :  { %860 = vmatpush3.msra.mxu1 %v247_v2  ;;  %839 = vmatpush3.msra.mxu0 %v1189_v44  ;;  %v56_v45 = vmul.f32 0.125, %v55_v36  ;;  %v734_v36 = vld [vmem:[%s1430_s2] ss:$0 sm:$0xff] }
  0x32   :  { %861 = vmatprep.subr.mxu1 %v1073_v0  ;;  %840 = vmatprep.subr.mxu0 %v1073_v0 }
  0x33   :  { %862 = vmatpush3.msra.mxu1 %v254_v9  ;;  %841 = vmatpush3.msra.mxu0 %v1195_v48  ;;  %v57_v49 = vsub.f32 %v1178_v37, %v56_v45  ;;  %v296_v37 = vand.u32 4294901760, %v295_v53 }
  0x34   :  { %863 = vmatprep.subr.mxu1 %v1073_v0  ;;  %842 = vmatprep.subr.mxu0 %v1073_v0 }
  0x35   :  { %864 = vmatpush3.msra.mxu1 %v261_v31  ;;  %843 = vmatpush3.msra.mxu0 %v1212_v57  ;;  %v58_v54 = vmul.f32 %v57_v49, %v57_v49  ;;  %v733_v31 = vld [vmem:[%s1429_s1] ss:$0 sm:$0xff] }
  0x36   :  { %865 = vmatprep.subr.mxu1 %v1073_v0  ;;  %844 = vmatprep.subr.mxu0 %v1073_v0 }
  0x37   :  { %866 = vmatpush3.msra.mxu1 %v268_v38  ;;  %845 = vmatpush3.msra.mxu0 %v1224_v63  ;;  %v59_v58 = vsel %vm48_vm2, %v58_v54, 0.0 }
  0x38   :  { %867 = vmatprep.subr.mxu1 %v1073_v0  ;;  %878 = vmatprep.subr.mxu0 %v1073_v0  ;;  %v60_v59 = vrot.slane %v59_v58, 4 }
  0x39   :  { %868 = vmatpush3.msra.mxu1 %v275_v46 }
  0x3a   :  { %869 = vmatprep.subr.mxu1 %v1073_v0  ;;  %v61_v60 = vadd.f32 %v60_v59, %v59_v58 }
  0x3b   :  { %870 = vmatpush3.msra.mxu1 %v282_v52 }
  0x3c   :  { %871 = vmatprep.subr.mxu1 %v1073_v0  ;;  %v62_v1 = vrot.slane %v61_v60, 2 }
  0x3d   :  { %872 = vmatpush3.msra.mxu1 %v289_v55 }
  0x3e   :  { %873 = vmatprep.subr.mxu1 %v1073_v0  ;;  %v63_v2 = vadd.f32 %v62_v1, %v61_v60 }
  0x3f   :  { %874 = vmatpush3.msra.mxu1 %v296_v37 }
  0x40   :  { %907 = vmatprep.subr.mxu1 %v1073_v0  ;;  %v64_v3 = vrot.slane %v63_v2, 1 }
  0x42   :  { %v65_v8 = vadd.f32 %v64_v3, %v63_v2 }
  0x44   :  { %v66_v9 = vmul.f32 0.125, %v65_v8 }
  0x46   :  { %v67_v14 = vadd.f32 1e-05, %v66_v9 }
  0x48   :  { %1001 = vrsqrt.f32 %v67_v14 }
  0x55   :  { %v1002_v30 = vpop.eup %1001 }
  0x56   :  { %v69_v33 = vmul.f32 %v1002_v30, %v57_v49 }
  0x58   :  { %v77_v38 = vmul.f32 %v733_v31, %v69_v33 }
  0x5a   :  { %v85_v39 = vadd.f32 %v734_v36, %v77_v38 }
  0x5c   :  { %v107_v45 = vsel %vm48_vm2, %v85_v39, 0 }
  0x5d   :  { %v1287_v46 = vand.u32 4294901760, %v107_v45 }
  0x5f   :  { %v1290_v47 = vsub.f32 %v107_v45, %v1287_v46  ;;  %876 = vmatmul.mubr.f32.vlgmr.msra.gmra.mxu1 %v1287_v46 }
  0x60   :  { %908 = vmatpush3.msra.mxu1 %v1122_v10  ;;  %933 = vmatprep.mubr.msk.f32.mxu1 %vm1074_vm0, %v1073_v0 }
  0x61   :  { %v193_v49 = vand.u32 4294901760, %v1290_v47  ;;  %909 = vmatprep.subr.mxu1 %v1073_v0 }
  0x62   :  { %910 = vmatpush3.msra.mxu1 %v1118_v5 }
  0x63   :  { %v194_v52 = vsub.f32 %v1290_v47, %v193_v49  ;;  %911 = vmatprep.subr.mxu1 %v1073_v0 }
  0x64   :  { %912 = vmatpush3.msra.mxu1 %v1120_v6 }
  0x65   :  { %v195_v53 = vand.u32 4294901760, %v194_v52  ;;  %913 = vmatprep.subr.mxu1 %v1073_v0 }
  0x66   :  { %914 = vmatpush3.msra.mxu1 %v1124_v11 }
  0x67   :  { %847 = vmatmul.mubr.f32.vlgmr.msra.gmra.mxu0 %v195_v53  ;;  %915 = vmatprep.subr.mxu1 %v1073_v0 }
  0x68   :  { %879 = vmatpush3.msra.mxu0 %v1140_v19  ;;  %916 = vmatpush3.msra.mxu1 %v1126_v12 }
  0x69   :  { %880 = vmatprep.subr.mxu0 %v1073_v0  ;;  %917 = vmatprep.subr.mxu1 %v1073_v0 }
  0x6a   :  { %881 = vmatpush3.msra.mxu0 %v1131_v16  ;;  %918 = vmatpush3.msra.mxu1 %v1128_v13 }
  0x6b   :  { %882 = vmatprep.subr.mxu0 %v1073_v0  ;;  %919 = vmatprep.subr.mxu1 %v1073_v0 }
  0x6c   :  { %883 = vmatpush3.msra.mxu0 %v1134_v17  ;;  %920 = vmatpush3.msra.mxu1 %v1136_v18 }
  0x6d   :  { %884 = vmatprep.subr.mxu0 %v1073_v0  ;;  %921 = vmatprep.subr.mxu1 %v1073_v0 }
  0x6e   :  { %885 = vmatpush3.msra.mxu0 %v1143_v20  ;;  %922 = vmatpush3.msra.mxu1 %v1151_v24 }
  0x6f   :  { %886 = vmatprep.subr.mxu0 %v1073_v0  ;;  %923 = vmatprep.subr.mxu1 %v1073_v0 }
  0x70   :  { %887 = vmatpush3.msra.mxu0 %v1146_v21  ;;  %924 = vmatpush3.msra.mxu1 %v1187_v43 }
  0x71   :  { %888 = vmatprep.subr.mxu0 %v1073_v0  ;;  %925 = vmatprep.subr.mxu1 %v1073_v0 }
  0x72   :  { %889 = vmatpush3.msra.mxu0 %v1157_v27  ;;  %926 = vmatpush3.msra.mxu1 %v1189_v44 }
  0x73   :  { %890 = vmatprep.subr.mxu0 %v1073_v0  ;;  %927 = vmatprep.subr.mxu1 %v1073_v0 }
  0x74   :  { %891 = vmatpush3.msra.mxu0 %v1164_v29  ;;  %928 = vmatpush3.msra.mxu1 %v1195_v48 }
  0x75   :  { %892 = vmatprep.subr.mxu0 %v1073_v0  ;;  %929 = vmatprep.subr.mxu1 %v1073_v0 }
  0x76   :  { %893 = vmatpush3.msra.mxu0 %v1176_v35  ;;  %930 = vmatpush3.msra.mxu1 %v1212_v57 }
  0x77   :  { %894 = vmatprep.subr.mxu0 %v1073_v0  ;;  %931 = vmatprep.subr.mxu1 %v1073_v0 }
  0x78   :  { %895 = vmatpush3.msra.mxu0 %v1203_v51  ;;  %904 = vmatprep.mubr.msk.f32.mxu0 %vm1074_vm0, %v1073_v0 }
  0x79   :  { %896 = vmatprep.subr.mxu0 %v1073_v0  ;;  %932 = vmatpush3.msra.mxu1 %v1224_v63 }
  0x7a   :  { %897 = vmatpush3.msra.mxu0 %v1210_v56  ;;  %965 = vmatprep.subr.mxu1 %v1073_v0 }
  0x7b   :  { %898 = vmatprep.subr.mxu0 %v1073_v0  ;;  %934 = vmatmul.mubr.f32.vlgmr.msra.gmra.mxu1 %v193_v49 }
  0x7c   :  { %899 = vmatpush3.msra.mxu0 %v1222_v62  ;;  %966 = vmatpush3.msra.mxu1 %v1122_v10 }
  0x7d   :  { %900 = vmatprep.subr.mxu0 %v1073_v0  ;;  %967 = vmatprep.subr.mxu1 %v1073_v0 }
  0x7e   :  { %901 = vmatpush3.msra.mxu0 %v1234_v7  ;;  %968 = vmatpush3.msra.mxu1 %v1118_v5 }
  0x7f   :  { %902 = vmatprep.subr.mxu0 %v1073_v0  ;;  %969 = vmatprep.subr.mxu1 %v1073_v0 }
  0x80   :  { %903 = vmatpush3.msra.mxu0 %v1244_v28  ;;  %970 = vmatpush3.msra.mxu1 %v1120_v6 }
  0x81   :  { %905 = vmatmul.mubr.f32.vlgmr.msra.gmra.mxu0 %v1290_v47  ;;  %936 = vmatprep.subr.mxu0 %v1073_v0 }
  0x82   :  { %937 = vmatpush3.msra.mxu0 %v210_v25  ;;  %971 = vmatprep.subr.mxu1 %v1073_v0 }
  0x83   :  { %938 = vmatprep.subr.mxu0 %v1073_v0  ;;  %972 = vmatpush3.msra.mxu1 %v1124_v11 }
  0x84   :  { %939 = vmatpush3.msra.mxu0 %v217_v22  ;;  %973 = vmatprep.subr.mxu1 %v1073_v0 }
  0x85   :  { %940 = vmatprep.subr.mxu0 %v1073_v0  ;;  %974 = vmatpush3.msra.mxu1 %v1126_v12 }
  0x86   :  { %941 = vmatpush3.msra.mxu0 %v224_v23  ;;  %975 = vmatprep.subr.mxu1 %v1073_v0 }
  0x87   :  { %942 = vmatprep.subr.mxu0 %v1073_v0  ;;  %976 = vmatpush3.msra.mxu1 %v1128_v13 }
  0x88   :  { %943 = vmatpush3.msra.mxu0 %v231_v26  ;;  %977 = vmatprep.subr.mxu1 %v1073_v0 }
  0x89   :  { %944 = vmatprep.subr.mxu0 %v1073_v0  ;;  %978 = vmatpush3.msra.mxu1 %v1136_v18  ;;  %v735_v18 = vld [vmem:[%s1432_s4] ss:$0 sm:$0xff] }
  0x8a   :  { %945 = vmatpush3.msra.mxu0 %v238_v32  ;;  %979 = vmatprep.subr.mxu1 %v1073_v0 }
  0x8b   :  { %946 = vmatprep.subr.mxu0 %v1073_v0  ;;  %980 = vmatpush3.msra.mxu1 %v1151_v24 }
  0x8c   :  { %947 = vmatpush3.msra.mxu0 %v245_v41  ;;  %981 = vmatprep.subr.mxu1 %v1073_v0 }
  0x8d   :  { %948 = vmatprep.subr.mxu0 %v1073_v0  ;;  %982 = vmatpush3.msra.mxu1 %v1187_v43 }
  0x8e   :  { %949 = vmatpush3.msra.mxu0 %v252_v42  ;;  %983 = vmatprep.subr.mxu1 %v1073_v0 }
  0x8f   :  { %950 = vmatprep.subr.mxu0 %v1073_v0  ;;  %984 = vmatpush3.msra.mxu1 %v1189_v44 }
  0x90   :  { %951 = vmatpush3.msra.mxu0 %v259_v50  ;;  %985 = vmatprep.subr.mxu1 %v1073_v0 }
  0x91   :  { %952 = vmatprep.subr.mxu0 %v1073_v0  ;;  %986 = vmatpush3.msra.mxu1 %v1195_v48 }
  0x92   :  { %953 = vmatpush3.msra.mxu0 %v266_v61  ;;  %987 = vmatprep.subr.mxu1 %v1073_v0 }
  0x93   :  { %954 = vmatprep.subr.mxu0 %v1073_v0  ;;  %988 = vmatpush3.msra.mxu1 %v1212_v57 }
  0x94   :  { %955 = vmatpush3.msra.mxu0 %v273_v4  ;;  %989 = vmatprep.subr.mxu1 %v1073_v0 }
  0x95   :  { %956 = vmatprep.subr.mxu0 %v1073_v0  ;;  %962 = vmatprep.mubr.msk.f32.mxu0 %vm1074_vm0, %v1073_v0 }
  0x96   :  { %957 = vmatpush3.msra.mxu0 %v280_v15  ;;  %990 = vmatpush3.msra.mxu1 %v1224_v63 }
  0x97   :  { %958 = vmatprep.subr.mxu0 %v1073_v0  ;;  %991 = vmatprep.mubr.msk.f32.mxu1 %vm1074_vm0, %v1073_v0 }
  0x98   :  { %959 = vmatpush3.msra.mxu0 %v287_v34  ;;  %992 = vmatmul.mubr.f32.vlgmr.msra.gmra.mxu1 %v1287_v46 }
  0x99   :  { %960 = vmatprep.subr.mxu0 %v1073_v0 }
  0x9a   :  { %961 = vmatpush3.msra.mxu0 %v294_v40 }
  0x9b   :  { %963 = vmatmul.mubr.f32.vlgmr.msra.gmra.mxu0 %v1287_v46 }
 0x11f   :  { %v333_v5 = vpop.f32.mrf.mxu1 }
 0x121   :  { %v877_v6 = vpop.f32.mrf.mxu1 }
 0x127   :  { %v197_v10 = vpop.f32.mrf.mxu0 }
 0x128   :  { %v198_v19 = vadd.f32 %v735_v18, %v197_v10 }
 0x129   :  { %v848_v11 = vpop.f32.mrf.mxu0 }
 0x12a   :  { %v334_v20 = vadd.f32 %v333_v5, %v198_v19 }
 0x13b   :  { %v517_v12 = vpop.f32.mrf.mxu1 }
 0x13d   :  { %v935_v13 = vpop.f32.mrf.mxu1 }
 0x141   :  { %v431_v16 = vpop.f32.mrf.mxu0 }
 0x142   :  { %v432_v0 = vadd.f32 %v431_v16, %v334_v20 }
 0x143   :  { %v906_v17 = vpop.f32.mrf.mxu0 }
 0x144   :  { %v518_v22 = vadd.f32 %v517_v12, %v432_v0 }
 0x158   :  { %v711_v21 = vpop.f32.mrf.mxu1 }
 0x15a   :  { %v993_v23 = vpop.f32.mrf.mxu1 }
 0x15b   :  { %v627_v24 = vpop.f32.mrf.mxu0 }
 0x15c   :  { %v628_v25 = vadd.f32 %v627_v24, %v518_v22 }
 0x15d   :  { %v964_v26 = vpop.f32.mrf.mxu0 }
 0x15e   :  { %v712_v27 = vadd.f32 %v711_v21, %v628_v25 }
 0x160   :  { %v715_v29 = vmax.f32 %v712_v27, 0.0 }
 0x162   :  { %716 = vst.msk [vmem:[#allocation7] sm:$0xff] %vm48_vm2, %v715_v29 }
 0x163   :  { %1054 = shalt.err (!%p1051_p0)
}
 0x164   :  { %726 = dma.vmem_to_hbm [thread:$0]  %s724_s8, 128, %s1433_s5, [#allocation4]  }
 0x165   :  { %1067 = dma.done.wait [#allocation4], 128  }
 0x166   :  { %1068 = vsyncadd [#allocation4], 4294967168 }
 0x167   :  { %730 = vsyncpa [#allocation3], 1 }
 0x168   :  { %731 = vsyncpa [#allocation6], 1 }
 0x169   :  { %732 = vsyncpa [#allocation4], 1 }

</bundles_post_ra>
